<compile_context>
chip_gen: v7x
topology: tpu7x:2x2x1
jax: 0.10.0
libtpu: 0.0.40
codegen_flags: <defaults>
</compile_context>

<pallas_src>
import functools

import numpy as np
import jax
import jax.numpy as jnp
from jax.experimental import pallas as pl
from jax.experimental.pallas import tpu as pltpu

N_MELS = 96
N_MELS_PAD = 128          # lane-dense padded output width (sliced back to 96 outside)
SAMPLE_RATE = 48000
MAG_SCALE_INIT = 1.23     # deterministic init of nn.Parameter(torch.tensor(1.23))

# (n_fft, hop_length, f_min, f_max)
BRANCHES = (
    (2048, 278, 0.0, 3000.0),
    (1024, 280, 500.0, 15000.0),
)


def _round_up(x, m):
    return -(-x // m) * m


# ---------------------------------------------------------------------------
# Parameter construction (deterministic; matches torchaudio defaults:
# periodic hann window, center=True reflect pad, power=2.0, onesided rFFT,
# mel_scale="htk", norm=None).
# ---------------------------------------------------------------------------
def _hann_window(n):
    i = np.arange(n, dtype=np.float64)
    return 0.5 - 0.5 * np.cos(2.0 * np.pi * i / n)


def _dft_matrices(n_fft):
    """Windowed real-DFT matrices: (n_fft, n_fft//2+1) cos / sin."""
    k_bins = n_fft // 2 + 1
    n = np.arange(n_fft, dtype=np.float64)[:, None]
    k = np.arange(k_bins, dtype=np.float64)[None, :]
    ang = 2.0 * np.pi * n * k / n_fft
    win = _hann_window(n_fft)[:, None]
    return (np.cos(ang) * win).astype(np.float32), (np.sin(ang) * win).astype(np.float32)


def _mel_fbank(n_fft, f_min, f_max, n_mels, sample_rate):
    """torchaudio.functional.melscale_fbanks (mel_scale='htk', norm=None)."""
    n_freqs = n_fft // 2 + 1
    all_freqs = np.linspace(0.0, sample_rate // 2, n_freqs)
    hz2mel = lambda f: 2595.0 * np.log10(1.0 + f / 700.0)
    mel2hz = lambda m: 700.0 * (10.0 ** (m / 2595.0) - 1.0)
    m_pts = np.linspace(hz2mel(f_min), hz2mel(f_max), n_mels + 2)
    f_pts = mel2hz(m_pts)
    f_diff = f_pts[1:] - f_pts[:-1]
    slopes = f_pts[None, :] - all_freqs[:, None]            # (n_freqs, n_mels+2)
    down = -slopes[:, :-2] / f_diff[:-1]
    up = slopes[:, 2:] / f_diff[1:]
    fb = np.maximum(0.0, np.minimum(down, up))              # (n_freqs, n_mels)
    return fb.astype(np.float32)


@functools.lru_cache(maxsize=None)
def _branch_constants(n_fft, f_min, f_max):
    """Per-branch constants (single K block):
       trig: (n_fft, 2*kp)   [cos | sin], hann-windowed
       fb  : (kp, N_MELS_PAD) mel filterbank, zero-padded
       kp  : round_up(trimmed nonzero fb support, 128)
    Frequency bins are trimmed to the filterbank's exact nonzero support —
    exact, since fb rows outside [f_min, f_max] are identically zero."""
    cosw, sinw = _dft_matrices(n_fft)
    fb = _mel_fbank(n_fft, f_min, f_max, N_MELS, SAMPLE_RATE)
    nz = np.flatnonzero(fb.sum(axis=1) > 0)
    k_lo, k_hi = int(nz.min()), int(nz.max()) + 1
    cosw, sinw, fb = cosw[:, k_lo:k_hi], sinw[:, k_lo:k_hi], fb[k_lo:k_hi]
    k = k_hi - k_lo
    kp = _round_up(k, 128)                       # branch 0 -> 128, branch 1 -> 384
    cosw = np.pad(cosw, ((0, 0), (0, kp - k)))
    sinw = np.pad(sinw, ((0, 0), (0, kp - k)))
    fb = np.pad(fb, ((0, kp - k), (0, N_MELS_PAD - N_MELS)))
    trig = np.concatenate([cosw, sinw], axis=1)  # (n_fft, 2*kp)
    return trig.astype(np.float32), fb.astype(np.float32), kp


def _frame_signal(x, n_fft, hop):
    """torch.stft(center=True, pad_mode='reflect') framing -> (B, F, n_fft)."""
    # TODO(synk): framing is an XLA gather that materializes a ~4-7x overlapped
    # frames array in HBM; could move in-kernel (memory_space=pl.ANY + manual
    # hop-strided DMA assembly) to reclaim bandwidth on v5e/v6e.
    _, t = x.shape
    pad = n_fft // 2
    xp = jnp.pad(x, ((0, 0), (pad, pad)), mode="reflect")
    n_frames = t // hop + 1
    idx = jnp.arange(n_frames)[:, None] * hop + jnp.arange(n_fft)[None, :]
    return xp[:, idx]


# ---------------------------------------------------------------------------
# Pallas kernel 1: per-sample normalization  x = ((x-min)/(max+1e-6) - 0.5)*2
# Emits bf16 directly (MXU operand dtype) to avoid an extra HBM pass.
# ---------------------------------------------------------------------------
def _normalize_kernel(x_ref, o_ref):
    x = x_ref[...]
    x = x - jnp.min(x, axis=1, keepdims=True)
    x = x / (jnp.max(x, axis=1, keepdims=True) + 1e-6)
    o_ref[...] = ((x - 0.5) * 2.0).astype(o_ref.dtype)


def _normalize_pallas(x, block_b=8):
    b, t = x.shape
    # Per-block VMEM: f32 input + bf16 output, double-buffered by the pipeline.
    per_row = t * (4 + 2) * 2
    while block_b > 1 and block_b * per_row > 24 * 1024 * 1024:
        block_b //= 2
    bp = _round_up(b, block_b)
    if bp > b:
        x = jnp.pad(x, ((0, bp - b), (0, 0)))
    vmem_limit = int(min(48 * 1024 * 1024, max(2 * block_b * per_row, 8 * 1024 * 1024)))
    out = pl.pallas_call(
        _normalize_kernel,
        out_shape=jax.ShapeDtypeStruct((bp, t), jnp.bfloat16),
        grid=(bp // block_b,),
        in_specs=[pl.BlockSpec((block_b, t), lambda i: (i, 0))],
        out_specs=pl.BlockSpec((block_b, t), lambda i: (i, 0)),
        compiler_params=pltpu.CompilerParams(
            dimension_semantics=("parallel",),
            vmem_limit_bytes=vmem_limit,
        ),
    )(x)
    return out[:b]


# ---------------------------------------------------------------------------
# Pallas kernel 2: mel spectrogram.  Grid = (M tiles,) all parallel; trig/fb
# resident (constant index map); single fused [cos|sin] dot + bf16 fb dot;
# pow finalize and single store per tile (no resident accumulator).
# ---------------------------------------------------------------------------
def _melspec_kernel(exp_ref, frames_ref, trig_ref, fb_ref, out_ref):
    # Fused [cos|sin] DFT: bf16 operands, f32 accumulate on the MXU.
    y = jnp.dot(frames_ref[...], trig_ref[...], preferred_element_type=jnp.float32)
    kp = y.shape[-1] // 2
    re = y[:, :kp]
    im = y[:, kp:]
    power = re * re + im * im                                  # |rFFT|^2 (f32)
    # Native bf16 MXU path for the filterbank projection (f32 accumulate).
    mel = jnp.dot(power.astype(jnp.bfloat16), fb_ref[...],
                  preferred_element_type=jnp.float32)
    e = exp_ref[0]
    # mel ** e with mel >= 0 (pow(0, e) == 0 for e > 0); guard log against 0.
    out_ref[...] = jnp.where(
        mel > 0.0, jnp.exp(e * jnp.log(jnp.maximum(mel, 1e-30))), 0.0
    )


def _pick_tile_m(m, tile_m):
    """M tile: multiple of 8, ~<= tile_m, and (when m allows) an even number of
    balanced tiles so the parallel axis spans both v7x TensorCores."""
    n_pairs = max(1, -(-m // (2 * tile_m)))
    n_tiles = 2 * n_pairs
    tm = _round_up(max(1, -(-m // n_tiles)), 8)
    return max(tm, 8)


def _melspec_pallas(frames2d, trig, fb, exponent, *, tile_m=512):
    m, n_fft = frames2d.shape
    two_kp = trig.shape[1]
    kp, n_mels_p = fb.shape                      # (kp, 128)

    tm = _pick_tile_m(m, tile_m)
    mp = _round_up(m, tm)
    if mp > m:
        frames2d = jnp.pad(frames2d, ((0, mp - m), (0, 0)))
    exp_arr = jnp.reshape(exponent, (1,)).astype(jnp.float32)

    return pl.pallas_call(
        _melspec_kernel,
        out_shape=jax.ShapeDtypeStruct((mp, n_mels_p), jnp.float32),
        grid_spec=pltpu.PrefetchScalarGridSpec(
            num_scalar_prefetch=0,
            grid=(mp // tm,),
            in_specs=[
                pl.BlockSpec(memory_space=pltpu.MemorySpace.SMEM),   # pow exponent
                pl.BlockSpec((tm, n_fft), lambda i: (i, 0)),         # frames (bf16)
                pl.BlockSpec((n_fft, two_kp), lambda i: (0, 0)),     # [cos|sin] (bf16, resident)
                pl.BlockSpec((kp, n_mels_p), lambda i: (0, 0)),      # mel fbank (bf16, resident)
            ],
            out_specs=pl.BlockSpec((tm, n_mels_p), lambda i: (i, 0)),
        ),
        compiler_params=pltpu.CompilerParams(
            dimension_semantics=("parallel",),
            vmem_limit_bytes=48 * 1024 * 1024,
        ),
    )(exp_arr, frames2d, trig, fb)


# ---------------------------------------------------------------------------
# Full forward pass (PyTorch BirdNETMelSpecLayer.forward equivalent)
# ---------------------------------------------------------------------------
def birdnet_melspec_forward(x, mag_scale=MAG_SCALE_INIT, spec_frames=511, tile_m=512):
    x = x.astype(jnp.float32)
    xn_bf = _normalize_pallas(x)                              # (B, T) bf16
    exponent = 1.0 / (1.0 + jnp.exp(jnp.float32(mag_scale)))

    mels = []
    for n_fft, hop, f_min, f_max in BRANCHES:
        trig_np, fb_np, _kp = _branch_constants(n_fft, f_min, f_max)
        frames = _frame_signal(xn_bf, n_fft, hop)             # (B, F, n_fft) bf16
        b, f, _ = frames.shape
        mel = _melspec_pallas(
            frames.reshape(b * f, n_fft),
            jnp.asarray(trig_np, dtype=jnp.bfloat16),
            jnp.asarray(fb_np, dtype=jnp.bfloat16),
            exponent,
            tile_m=tile_m,
        )                                                     # (Mp, 128) f32
        mel = mel[:b * f, :N_MELS].reshape(b, f, N_MELS)      # drop padding
        mel = mel.transpose(0, 2, 1)                          # (B, n_mels, F)
        mel = mel[:, ::-1, :]                                 # torch.flip(dims=[1])
        mels.append(mel)

    n_frames = min(spec_frames, mels[0].shape[-1], mels[1].shape[-1])
    return jnp.stack([m[..., :n_frames] for m in mels], axis=1)  # (B, 2, 96, frames)


# ---------------------------------------------------------------------------
# Pure-JAX f32 reference (same math, no Pallas) for correctness checking.
# ---------------------------------------------------------------------------
def _reference_forward(x, mag_scale=MAG_SCALE_INIT, spec_frames=511):
    x = x.astype(jnp.float32)
    x = x - jnp.min(x, axis=1, keepdims=True)
    x = x / (jnp.max(x, axis=1, keepdims=True) + 1e-6)
    x = (x - 0.5) * 2.0
    exponent = 1.0 / (1.0 + jnp.exp(jnp.float32(mag_scale)))
    hi = jax.lax.Precision.HIGHEST
    mels = []
    for n_fft, hop, f_min, f_max in BRANCHES:
        cosw, sinw = _dft_matrices(n_fft)
        fb = _mel_fbank(n_fft, f_min, f_max, N_MELS, SAMPLE_RATE)
        frames = _frame_signal(x, n_fft, hop)
        re = jnp.einsum("bfn,nk->bfk", frames, cosw, precision=hi)
        im = jnp.einsum("bfn,nk->bfk", frames, sinw, precision=hi)
        power = re * re + im * im
        mel = jnp.einsum("bfk,km->bfm", power, fb, precision=hi)
        mel = jnp.power(mel, exponent)
        mel = mel.transpose(0, 2, 1)[:, ::-1, :]
        mels.append(mel)
    n_frames = min(spec_frames, mels[0].shape[-1], mels[1].shape[-1])
    return jnp.stack([m[..., :n_frames] for m in mels], axis=1)


if __name__ == "__main__":
    key = jax.random.PRNGKey(0)
    # Small input: T=2048 gives 2048//278+1 == 2048//280+1 == 8 frames per branch
    # (the full-size module uses T=144000 -> 511 frames after slicing).
    B, T = 2, 2048
    x = jax.random.normal(key, (B, T), dtype=jnp.float32)

    out = jax.block_until_ready(birdnet_melspec_forward(x))
    ref = jax.block_until_ready(_reference_forward(x))

    n_frames = min(511, T // 278 + 1, T // 280 + 1)
    assert out.shape == (B, 2, N_MELS, n_frames), out.shape
    assert out.dtype == jnp.float32
    np.testing.assert_allclose(np.asarray(out), np.asarray(ref), rtol=5e-2, atol=5e-2)
    print("KERNEL_OK")
</pallas_src>

<mosaic_0001>
module attributes {stable_mosaic.version = 11 : i64} {
  func.func @_normalize_kernel(%arg0: i32, %arg1: memref<8x2048xf32, #tpu.memory_space<vmem>>, %arg2: memref<8x2048xbf16, #tpu.memory_space<vmem>>) attributes {dimension_semantics = [#tpu.dimension_semantics<parallel>], iteration_bounds = array<i64: 1>, scalar_prefetch = 0 : i64, scratch_operands = 0 : i64, tpu.core_type = #tpu.core_type<tc>, window_params = [{transform_indices = @transform_0, window_bounds = array<i64: 8, 2048>}, {transform_indices = @transform_1, window_bounds = array<i64: 8, 2048>}]} {
    %c0 = arith.constant 0 : index
    %c0_0 = arith.constant 0 : index
    %0 = vector.load %arg1[%c0, %c0_0] : memref<8x2048xf32, #tpu.memory_space<vmem>>, vector<8x2048xf32>
    %cst = arith.constant dense<0x7F800000> : vector<8xf32>
    %1 = vector.multi_reduction <minimumf>, %0, %cst [1] : vector<8x2048xf32> to vector<8xf32>
    %2 = vector.shape_cast %1 : vector<8xf32> to vector<8x1xf32>
    %3 = vector.broadcast %2 : vector<8x1xf32> to vector<8x2048xf32>
    %4 = arith.subf %0, %3 : vector<8x2048xf32>
    %cst_1 = arith.constant dense<0xFF800000> : vector<8xf32>
    %5 = vector.multi_reduction <maximumf>, %4, %cst_1 [1] : vector<8x2048xf32> to vector<8xf32>
    %6 = vector.shape_cast %5 : vector<8xf32> to vector<8x1xf32>
    %cst_2 = arith.constant 9.99999997E-7 : f32
    %7 = vector.broadcast %cst_2 : f32 to vector<8x1xf32>
    %8 = arith.addf %6, %7 : vector<8x1xf32>
    %9 = vector.broadcast %8 : vector<8x1xf32> to vector<8x2048xf32>
    %10 = arith.divf %4, %9 : vector<8x2048xf32>
    %cst_3 = arith.constant 5.000000e-01 : f32
    %11 = vector.broadcast %cst_3 : f32 to vector<8x2048xf32>
    %12 = arith.subf %10, %11 : vector<8x2048xf32>
    %cst_4 = arith.constant 2.000000e+00 : f32
    %13 = vector.broadcast %cst_4 : f32 to vector<8x2048xf32>
    %14 = arith.mulf %12, %13 : vector<8x2048xf32>
    %15 = arith.truncf %14 : vector<8x2048xf32> to vector<8x2048xbf16>
    %c0_5 = arith.constant 0 : index
    %c0_6 = arith.constant 0 : index
    %16 = vector.load %arg2[%c0_5, %c0_6] : memref<8x2048xbf16, #tpu.memory_space<vmem>>, vector<8x2048xbf16>
    tpu.vector_store %arg2[%c0_5, %c0_6], %15 {strides = array<i32>} : memref<8x2048xbf16, #tpu.memory_space<vmem>>, vector<8x2048xbf16>,
    return
  }
  func.func @transform_0(%arg0: i32) -> (i32, i32) {
    %c0_i32 = arith.constant 0 : i32
    %c0_i32_0 = arith.constant 0 : i32
    return %arg0, %c0_i32 : i32, i32
  }
  func.func @transform_1(%arg0: i32) -> (i32, i32) {
    %c0_i32 = arith.constant 0 : i32
    %c0_i32_0 = arith.constant 0 : i32
    return %arg0, %c0_i32 : i32, i32
  }
}

</mosaic_0001>

<bundles_post_ra>
// kernel: tpu_custom_call.1
= control target key start
LH: loop header
LB: loop body
LE: loop exit
PB: predicated region body
PF: predicated region fallthrough
CT: control target
= control target key end

     0   :  { %6 = vsyncpa [#allocation3], 0  ;;  %s344_s0 = inlined_call_operand.hbm [shape: f32[8,2048], index: 0, kind: input, shape index: {}]   ;;  %s345_s1 = inlined_call_operand.hbm [shape: bf16[8,2048], index: 1, kind: output, shape index: {}]  }
   0x1   :  { %7 = vsyncpa [#allocation4], 0  ;;  %s308_s6 = smov [#allocation2]   ;;  %s260_s10 = scalar_lea.hbm %s344_s0, 2048 }
   0x2   :  { %s14_s7 = sshll.u32 %s308_s6, 4  ;;  %p261_p0 = scmp.ne.s32.totalorder %s344_s0, %s260_s10  ;;  %s15_s7 = int_to_ptr.vmem [resolvable:$true] %s14_s7 }
   0x3   :  { %p264_p1 = scmp.lt.u32.totalorder %s260_s10, %s344_s0 }
   0x5   :  { %p266_p2 = pnand %p264_p1, %p261_p0 }
   0x7   :  { %269 = shalt.err (!%p266_p2)
}
   0x8   :  { %s270_s15 = scalar_lea.vmem %s15_s7, 2048  ;;  %p275_p4 = scmp.lt.s32.totalorder %s15_s7, %s15_s7 }
   0x9   :  { %p271_p3 = scmp.ne.s32.totalorder %s15_s7, %s270_s15  ;;  %p276_p5 = scmp.lt.s32.totalorder %s270_s15, %s270_s15 }
   0xb   :  { %p277_p6 = por %p276_p5, %p275_p4 }
   0xd   :  { %p278_p7 = pnand %p277_p6, %p271_p3 }
   0xf   :  { %281 = shalt.err (!%p278_p7)
}
  0x10   :  { %17 = dma.hbm_to_vmem [thread:$0]  %s344_s0, 2048, %s15_s7, [#allocation3]  }
  0x11   :  { %304 = dma.done.wait [#allocation3], 2048  }
  0x12   :  { %305 = vsyncadd [#allocation3], 4294965248  ;;  %v21_v0 = vld [vmem:[#allocation2] sm:$0xff]  ;;  %v22_v1 = vld [vmem:[#allocation2 + $0x8] sm:$0xff]  ;;  %s309_s0 = smov [#allocation5]  }
  0x13   :  { %v23_v2 = vld [vmem:[#allocation2 + $0x10] sm:$0xff]  ;;  %v24_v3 = vld [vmem:[#allocation2 + $0x18] sm:$0xff]  ;;  %v25_v4 = vld [vmem:[#allocation2 + $0x20] sm:$0xff]  ;;  %s215_s18 = sshll.u32 %s309_s0, 4  ;;  %s216_s18 = int_to_ptr.vmem [resolvable:$true] %s215_s18 }
  0x14   :  { %v26_v5 = vld [vmem:[#allocation2 + $0x28] sm:$0xff]  ;;  %v27_v6 = vld [vmem:[#allocation2 + $0x30] sm:$0xff]  ;;  %v28_v7 = vld [vmem:[#allocation2 + $0x38] sm:$0xff]  ;;  %v37_v9 = vmin.f32 %v21_v0, %v25_v4  ;;  %s282_s19 = scalar_lea.vmem %s216_s18, 1024  ;;  %p287_p9 = scmp.lt.s32.totalorder %s216_s18, %s216_s18 }
  0x15   :  { %v29_v8 = vld [vmem:[#allocation2 + $0x40] sm:$0xff]  ;;  %v38_v10 = vmin.f32 %v22_v1, %v26_v5  ;;  %v30_v11 = vld [vmem:[#allocation2 + $0x48] sm:$0xff]  ;;  %v31_v12 = vld [vmem:[#allocation2 + $0x50] sm:$0xff]  ;;  %v39_v14 = vmin.f32 %v23_v2, %v27_v6  ;;  %v40_v15 = vmin.f32 %v24_v3, %v28_v7  ;;  %p283_p8 = scmp.ne.s32.totalorder %s216_s18, %s282_s19  ;;  %p288_p10 = scmp.lt.s32.totalorder %s282_s19, %s282_s19 }
  0x16   :  { %v32_v13 = vld [vmem:[#allocation2 + $0x58] sm:$0xff]  ;;  %v33_v16 = vld [vmem:[#allocation2 + $0x60] sm:$0xff]  ;;  %v34_v17 = vld [vmem:[#allocation2 + $0x68] sm:$0xff]  ;;  %v41_v19 = vmin.f32 %v37_v9, %v29_v8 }
  0x17   :  { %v35_v18 = vld [vmem:[#allocation2 + $0x70] sm:$0xff]  ;;  %v42_v20 = vmin.f32 %v38_v10, %v30_v11  ;;  %v36_v21 = vld [vmem:[#allocation2 + $0x78] sm:$0xff]  ;;  %v43_v22 = vmin.f32 %v39_v14, %v31_v12  ;;  %v44_v23 = vmin.f32 %v40_v15, %v32_v13  ;;  %p289_p11 = por %p288_p10, %p287_p9 }
  0x18   :  { %v45_v24 = vmin.f32 %v41_v19, %v33_v16 }
  0x19   :  { %v46_v25 = vmin.f32 %v42_v20, %v34_v17  ;;  %v47_v26 = vmin.f32 %v43_v22, %v35_v18  ;;  %v48_v27 = vmin.f32 %v44_v23, %v36_v21  ;;  %p290_p12 = pnand %p289_p11, %p283_p8 }
  0x1b   :  { %v49_v28 = vmin.f32 %v45_v24, %v46_v25  ;;  %v50_v29 = vmin.f32 %v47_v26, %v48_v27 }
  0x1d   :  { %v51_v30 = vmin.f32 %v49_v28, %v50_v29 }
  0x1f   :  { %52 = vmin.xlane.f32.xlu0 %v51_v30 }
  0xac   :  { %v53_v31 = vpop.xlane.xlu0 %52 }
  0xad   :  { %v54_v32 = vsub.f32 %v21_v0, %v53_v31  ;;  %v55_v33 = vsub.f32 %v22_v1, %v53_v31  ;;  %v56_v34 = vsub.f32 %v23_v2, %v53_v31  ;;  %v57_v35 = vsub.f32 %v24_v3, %v53_v31 }
  0xae   :  { %v58_v36 = vsub.f32 %v25_v4, %v53_v31  ;;  %v59_v37 = vsub.f32 %v26_v5, %v53_v31  ;;  %v60_v38 = vsub.f32 %v27_v6, %v53_v31  ;;  %v61_v39 = vsub.f32 %v28_v7, %v53_v31 }
  0xaf   :  { %v62_v40 = vsub.f32 %v29_v8, %v53_v31  ;;  %v63_v41 = vsub.f32 %v30_v11, %v53_v31  ;;  %v64_v42 = vsub.f32 %v31_v12, %v53_v31  ;;  %v65_v43 = vsub.f32 %v32_v13, %v53_v31 }
  0xb0   :  { %v70_v44 = vmax.f32 %v54_v32, %v58_v36  ;;  %v71_v45 = vmax.f32 %v55_v33, %v59_v37  ;;  %v72_v46 = vmax.f32 %v56_v34, %v60_v38  ;;  %v73_v47 = vmax.f32 %v57_v35, %v61_v39 }
  0xb1   :  { %v66_v48 = vsub.f32 %v33_v16, %v53_v31  ;;  %v67_v49 = vsub.f32 %v34_v17, %v53_v31  ;;  %v68_v50 = vsub.f32 %v35_v18, %v53_v31  ;;  %v69_v51 = vsub.f32 %v36_v21, %v53_v31 }
  0xb2   :  { %v74_v52 = vmax.f32 %v70_v44, %v62_v40  ;;  %v75_v53 = vmax.f32 %v71_v45, %v63_v41  ;;  %v76_v54 = vmax.f32 %v72_v46, %v64_v42  ;;  %v77_v55 = vmax.f32 %v73_v47, %v65_v43 }
  0xb4   :  { %v78_v56 = vmax.f32 %v74_v52, %v66_v48  ;;  %v79_v57 = vmax.f32 %v75_v53, %v67_v49  ;;  %v80_v58 = vmax.f32 %v76_v54, %v68_v50  ;;  %v81_v59 = vmax.f32 %v77_v55, %v69_v51 }
  0xb6   :  { %v82_v60 = vmax.f32 %v78_v56, %v79_v57  ;;  %v83_v61 = vmax.f32 %v80_v58, %v81_v59 }
  0xb8   :  { %v84_v62 = vmax.f32 %v82_v60, %v83_v61 }
  0xba   :  { %85 = vmax.xlane.f32.xlu0 %v84_v62 }
 0x147   :  { %v86_v63 = vpop.xlane.xlu0 %85 }
 0x148   :  { %v87_v0 = vadd.f32 1e-06, %v86_v63 }
 0x14a   :  { %258 = vrcp.f32 %v87_v0 }
 0x154   :  { %v259_v1 = vpop.eup %258 }
 0x155   :  { %v89_v2 = vmul.f32 %v259_v1, %v54_v32  ;;  %v90_v3 = vmul.f32 %v259_v1, %v55_v33  ;;  %v91_v4 = vmul.f32 %v259_v1, %v56_v34  ;;  %v92_v5 = vmul.f32 %v259_v1, %v57_v35 }
 0x156   :  { %v93_v6 = vmul.f32 %v259_v1, %v58_v36  ;;  %v94_v7 = vmul.f32 %v259_v1, %v59_v37  ;;  %v95_v8 = vmul.f32 %v259_v1, %v60_v38  ;;  %v96_v9 = vmul.f32 %v259_v1, %v61_v39 }
 0x157   :  { %v97_v10 = vmul.f32 %v259_v1, %v62_v40  ;;  %v98_v11 = vmul.f32 %v259_v1, %v63_v41  ;;  %v99_v12 = vmul.f32 %v259_v1, %v64_v42  ;;  %v100_v13 = vmul.f32 %v259_v1, %v65_v43 }
 0x158   :  { %v101_v14 = vmul.f32 %v259_v1, %v66_v48  ;;  %v102_v15 = vmul.f32 %v259_v1, %v67_v49  ;;  %v103_v16 = vmul.f32 %v259_v1, %v68_v50  ;;  %v104_v17 = vmul.f32 %v259_v1, %v69_v51 }
 0x159   :  { %v224_v18 = vadd.f32 -0.5, %v89_v2  ;;  %v225_v19 = vadd.f32 -0.5, %v90_v3  ;;  %v226_v20 = vadd.f32 -0.5, %v91_v4  ;;  %v227_v21 = vadd.f32 -0.5, %v92_v5 }
 0x15a   :  { %v228_v22 = vadd.f32 -0.5, %v93_v6  ;;  %v229_v23 = vadd.f32 -0.5, %v94_v7  ;;  %v230_v24 = vadd.f32 -0.5, %v95_v8  ;;  %v231_v25 = vadd.f32 -0.5, %v96_v9 }
 0x15b   :  { %v232_v26 = vadd.f32 -0.5, %v97_v10  ;;  %v233_v27 = vadd.f32 -0.5, %v98_v11  ;;  %v234_v28 = vadd.f32 -0.5, %v99_v12  ;;  %v235_v29 = vadd.f32 -0.5, %v100_v13 }
 0x15c   :  { %v236_v30 = vadd.f32 -0.5, %v101_v14  ;;  %v237_v31 = vadd.f32 -0.5, %v102_v15  ;;  %v238_v32 = vadd.f32 -0.5, %v103_v16  ;;  %v239_v33 = vadd.f32 -0.5, %v104_v17 }
 0x15d   :  { %v121_v34 = vmul.f32 2.0, %v224_v18  ;;  %v122_v35 = vmul.f32 2.0, %v225_v19  ;;  %v123_v36 = vmul.f32 2.0, %v226_v20  ;;  %v124_v37 = vmul.f32 2.0, %v227_v21 }
 0x15e   :  { %v125_v38 = vmul.f32 2.0, %v228_v22  ;;  %v126_v39 = vmul.f32 2.0, %v229_v23  ;;  %v127_v40 = vmul.f32 2.0, %v230_v24  ;;  %v128_v41 = vmul.f32 2.0, %v231_v25 }
 0x15f   :  { %v129_v42 = vmul.f32 2.0, %v232_v26  ;;  %v130_v43 = vmul.f32 2.0, %v233_v27  ;;  %v131_v44 = vmul.f32 2.0, %v234_v28  ;;  %v132_v45 = vmul.f32 2.0, %v235_v29 }
 0x160   :  { %v133_v46 = vmul.f32 2.0, %v236_v30  ;;  %v134_v47 = vmul.f32 2.0, %v237_v31  ;;  %v135_v48 = vmul.f32 2.0, %v238_v32  ;;  %v136_v49 = vmul.f32 2.0, %v239_v33 }
 0x161   :  { %v248_v50 = vpack.c.bf16 %v122_v35, %v121_v34  ;;  %v249_v51 = vpack.c.bf16 %v124_v37, %v123_v36  ;;  %v250_v52 = vpack.c.bf16 %v126_v39, %v125_v38  ;;  %v251_v53 = vpack.c.bf16 %v128_v41, %v127_v40 }
 0x162   :  { %v252_v54 = vpack.c.bf16 %v130_v43, %v129_v42  ;;  %v253_v55 = vpack.c.bf16 %v132_v45, %v131_v44  ;;  %v254_v56 = vpack.c.bf16 %v134_v47, %v133_v46  ;;  %v255_v57 = vpack.c.bf16 %v136_v49, %v135_v48 }
 0x163   :  { %201 = vst [vmem:[#allocation5] sm:$0xff] %v248_v50  ;;  %202 = vst [vmem:[#allocation5 + $0x8] sm:$0xff] %v249_v51 }
 0x164   :  { %203 = vst [vmem:[#allocation5 + $0x10] sm:$0xff] %v250_v52  ;;  %204 = vst [vmem:[#allocation5 + $0x18] sm:$0xff] %v251_v53 }
 0x165   :  { %205 = vst [vmem:[#allocation5 + $0x20] sm:$0xff] %v252_v54  ;;  %206 = vst [vmem:[#allocation5 + $0x28] sm:$0xff] %v253_v55 }
 0x166   :  { %207 = vst [vmem:[#allocation5 + $0x30] sm:$0xff] %v254_v56  ;;  %208 = vst [vmem:[#allocation5 + $0x38] sm:$0xff] %v255_v57 }
 0x167   :  { %293 = shalt.err (!%p290_p12)
}
 0x168   :  { %s294_s22 = scalar_lea.hbm %s345_s1, 1024 }
 0x169   :  { %p295_p13 = scmp.ne.s32.totalorder %s345_s1, %s294_s22  ;;  %p298_p0 = scmp.lt.u32.totalorder %s294_s22, %s345_s1 }
 0x16b   :  { %p300_p1 = pnand %p298_p0, %p295_p13 }
 0x16d   :  { %303 = shalt.err (!%p300_p1)
}
 0x16e   :  { %218 = dma.vmem_to_hbm [thread:$0]  %s216_s18, 1024, %s345_s1, [#allocation4]  }
 0x16f   :  { %306 = dma.done.wait [#allocation4], 1024  }
 0x170   :  { %307 = vsyncadd [#allocation4], 4294966272 }
 0x171   :  { %222 = vsyncpa [#allocation3], 1 }
 0x172   :  { %223 = vsyncpa [#allocation4], 1 }

</bundles_post_ra>
